<compile_context>
chip_gen: v5e
topology: v5e:2x2
jax: 0.10.0
libtpu: 0.0.40
codegen_flags: <defaults>
</compile_context>

<pallas_src>
import functools

import jax
import jax.numpy as jnp
from jax.experimental import pallas as pl
from jax.experimental.pallas import tpu as pltpu


def _round_up(x, m):
    return (x + m - 1) // m * m


def _vmem_budget():
    """Physical VMEM size and a safe scoped-VMEM limit for this chip."""
    try:
        phys = int(pltpu.get_tpu_info().vmem_capacity_bytes)
    except Exception:
        phys = 64 * 1024 * 1024                       # conservative (v7x per-TC)
    # ~40 MiB scoped on v7x (64 MiB phys), ~80 MiB on v5e/v6e (128 MiB phys).
    limit = min((phys * 5) // 8, 112 * 1024 * 1024)
    return phys, limit


def _tile_footprint(tm, tk, Dp, wb):
    """Approximate VMEM bytes for one pipelined step: double-buffered tiles,
    persistent scratch, and the h intermediate the compiler materializes."""
    return (2 * tm * Dp * 4          # x tile (f32), double-buffered
            + 2 * tm * Dp * 4        # out tile (f32), double-buffered
            + 2 * 2 * Dp * tk * wb   # W1^T / W2^T chunks, double-buffered
            + tm * Dp * 4            # y accumulator scratch (f32)
            + tm * Dp * wb           # bf16 x scratch
            + tm * tk * (4 + wb)     # h intermediate (f32 + bf16 copy)
            + 256 * 1024)            # biases / gamma / beta / mask + slack


def _tk_candidates(Fp):
    """Multiples of 128 that divide Fp, descending (first entry == Fp)."""
    units = Fp // 128
    return [d * 128 for d in range(units, 0, -1) if units % d == 0]


def _select_tiles(N, Dp, Fp, wb, budget, phys_vmem):
    """Pick (token tile tm, d_ff chunk tk).  Priority:
       1) fully VMEM-resident weights (tk == Fp) with a large token tile,
       2) streamed weight chunks, still with a large token tile,
       3) shrink the token tile as a last resort."""
    Nr = _round_up(N, 8)
    tm_cap = 512 if phys_vmem <= 96 * 1024 * 1024 else 1024   # v7x: 64 MiB VMEM
    big_tms = [t for t in (1024, 512, 256) if t <= tm_cap]
    small_tms = [128, 64, 32, 16, 8]
    tks = _tk_candidates(Fp)

    pairs = [(tm, Fp) for tm in big_tms]                 # residency first
    for tk in tks[1:]:
        pairs += [(tm, tk) for tm in big_tms]            # then streamed chunks
    for tm in small_tms:
        pairs += [(tm, tk) for tk in tks]                # then smaller tiles

    seen = set()
    choice = None
    for tm, tk in pairs:
        tm_e = min(tm, Nr)
        if (tm_e, tk) in seen:
            continue
        seen.add((tm_e, tk))
        if _tile_footprint(tm_e, tk, Dp, wb) <= budget:
            choice = (tm_e, tk)
            break
    if choice is None:                                   # nothing fits cleanly
        choice = (min(8, Nr), 128)

    tm_e, tk = choice
    # Keep >= 2 token tiles when there is enough work so the "parallel" axis
    # can shard across v7x's two TensorCores (harmless on single-TC chips).
    if tm_e >= Nr and Nr >= 512:
        tm_e = _round_up((Nr + 1) // 2, 8)
    return tm_e, tk


def _ffn_kernel(x_ref, mask_ref, w1_ref, b1_ref, w2_ref, b2_ref, gamma_ref,
                beta_ref, o_ref, xb_ref, acc_ref, *, d_model, eps,
                compute_dtype, masked):
    """Grid = (token tiles, d_ff chunks); the d_ff axis is the reduction.
    When tk == Fp the weight block index is constant, so W1/W2 are DMA'd from
    HBM only once for the whole kernel (VMEM-resident weights)."""
    k = pl.program_id(1)

    @pl.when(k == 0)
    def _():
        # One bf16 cast of the activation tile, reused by every d_ff chunk.
        xb_ref[...] = x_ref[...].astype(compute_dtype)
        acc_ref[...] = jnp.zeros_like(acc_ref)

    # conv1 chunk (kernel_size=1): x @ W1^T[:, chunk] + b1[chunk], ReLU.
    h = jnp.dot(xb_ref[...], w1_ref[...], preferred_element_type=jnp.float32)
    h = jnp.maximum(h + b1_ref[...], 0.0)
    # conv2 chunk: accumulate h @ W2^T[chunk, :] in f32.
    acc_ref[...] += jnp.dot(h.astype(compute_dtype), w2_ref[...],
                            preferred_element_type=jnp.float32)

    @pl.when(k == pl.num_programs(1) - 1)
    def _():
        # residual + LayerNormalization (torch .std(): unbiased, divisor N-1;
        # the reference divides by (std + eps), NOT sqrt(var + eps)). All f32.
        z = x_ref[...] + acc_ref[...] + b2_ref[...]      # padded lanes are 0
        mean = jnp.sum(z, axis=-1, keepdims=True) * (1.0 / d_model)
        diff = z - mean
        if masked:                         # only when d_model % 128 != 0
            diff = diff * mask_ref[...]    # (1, Dp) lane mask, broadcast
        var = jnp.sum(diff * diff, axis=-1, keepdims=True) * (1.0 / (d_model - 1))
        inv = 1.0 / (jnp.sqrt(var) + eps)  # exact: only tm values per tile
        o_ref[...] = gamma_ref[...] * (diff * inv) + beta_ref[...]


def prepare_poswise_ffn_weights(w1, b1, w2, b2, gamma, beta, *,
                                compute_dtype=jnp.bfloat16):
    """Transpose / pad / cast the Conv1d(k=1) parameters once.

    w1: (d_ff, d_model), b1: (d_ff,), w2: (d_model, d_ff), b2: (d_model,),
    gamma/beta: (d_model,).  For repeated inference call this once and reuse
    the result with poswise_ffn_apply() (hoists the weight repack HBM pass
    out of the per-call path)."""
    d_ff, d_model = w1.shape
    Dp = _round_up(d_model, 128)
    Fp = _round_up(d_ff, 128)

    def pad2(a, rows, cols):
        r, c = a.shape
        if (r, c) != (rows, cols):
            a = jnp.pad(a, ((0, rows - r), (0, cols - c)))
        return a

    w1_t = pad2(w1.T, Dp, Fp).astype(compute_dtype)                  # (Dp, Fp)
    w2_t = pad2(w2.T, Fp, Dp).astype(compute_dtype)                  # (Fp, Dp)
    b1_2 = pad2(b1.reshape(1, d_ff).astype(jnp.float32), 1, Fp)
    b2_2 = pad2(b2.reshape(1, d_model).astype(jnp.float32), 1, Dp)
    g_2 = pad2(gamma.reshape(1, d_model).astype(jnp.float32), 1, Dp)
    be_2 = pad2(beta.reshape(1, d_model).astype(jnp.float32), 1, Dp)
    mask = (jnp.arange(Dp, dtype=jnp.int32) < d_model)
    mask = mask.astype(jnp.float32).reshape(1, Dp)
    return dict(d_model=d_model, d_ff=d_ff, Dp=Dp, Fp=Fp,
                w1_t=w1_t, b1=b1_2, w2_t=w2_t, b2=b2_2,
                gamma=g_2, beta=be_2, mask=mask, compute_dtype=compute_dtype)


def poswise_ffn_apply(x, prep, *, eps=1e-6, vmem_limit_bytes=None):
    """x: (B, S, d_model) -> (B, S, d_model), f32."""
    B, S, d_model = x.shape
    assert d_model == prep["d_model"]
    assert d_model >= 2, "unbiased std needs d_model >= 2"
    Dp, Fp = prep["Dp"], prep["Fp"]
    compute_dtype = prep["compute_dtype"]
    wb = jnp.dtype(compute_dtype).itemsize

    N = B * S
    phys, auto_limit = _vmem_budget()
    if vmem_limit_bytes is None:
        vmem_limit_bytes = auto_limit
    budget = vmem_limit_bytes - 2 * 1024 * 1024          # compiler headroom

    tm, tk = _select_tiles(N, Dp, Fp, wb, budget, phys)
    Np = _round_up(N, tm)

    x2 = x.reshape(N, d_model).astype(jnp.float32)
    if (Np, Dp) != (N, d_model):         # skip the pad pass when already aligned
        x2 = jnp.pad(x2, ((0, Np - N), (0, Dp - d_model)))

    kernel = functools.partial(
        _ffn_kernel, d_model=d_model, eps=eps, compute_dtype=compute_dtype,
        masked=(Dp != d_model))

    out = pl.pallas_call(
        kernel,
        out_shape=jax.ShapeDtypeStruct((Np, Dp), jnp.float32),
        grid_spec=pltpu.PrefetchScalarGridSpec(
            num_scalar_prefetch=0,
            grid=(Np // tm, Fp // tk),                   # reduction (d_ff) last
            in_specs=[
                pl.BlockSpec((tm, Dp), lambda i, k: (i, 0)),    # x tile
                pl.BlockSpec((1, Dp), lambda i, k: (0, 0)),     # lane mask
                pl.BlockSpec((Dp, tk), lambda i, k: (0, k)),    # W1^T chunk
                pl.BlockSpec((1, tk), lambda i, k: (0, k)),     # b1 chunk
                pl.BlockSpec((tk, Dp), lambda i, k: (k, 0)),    # W2^T chunk
                pl.BlockSpec((1, Dp), lambda i, k: (0, 0)),     # b2
                pl.BlockSpec((1, Dp), lambda i, k: (0, 0)),     # gamma
                pl.BlockSpec((1, Dp), lambda i, k: (0, 0)),     # beta
            ],
            out_specs=pl.BlockSpec((tm, Dp), lambda i, k: (i, 0)),
            scratch_shapes=[pltpu.VMEM((tm, Dp), compute_dtype),   # bf16 x tile
                            pltpu.VMEM((tm, Dp), jnp.float32)],    # y accumulator
        ),
        compiler_params=pltpu.CompilerParams(
            dimension_semantics=("parallel", "arbitrary"),
            vmem_limit_bytes=vmem_limit_bytes),
    )(x2, prep["mask"], prep["w1_t"], prep["b1"], prep["w2_t"], prep["b2"],
      prep["gamma"], prep["beta"])

    if (Np, Dp) != (N, d_model):
        out = out[:N, :d_model]
    return out.reshape(B, S, d_model)


def poswise_ffn(x, w1, b1, w2, b2, gamma, beta, *, eps=1e-6,
                compute_dtype=jnp.bfloat16, vmem_limit_bytes=None):
    """Convenience one-shot wrapper (prep + apply).  For repeated inference,
    call prepare_poswise_ffn_weights() once and reuse with poswise_ffn_apply()."""
    prep = prepare_poswise_ffn_weights(w1, b1, w2, b2, gamma, beta,
                                       compute_dtype=compute_dtype)
    return poswise_ffn_apply(x, prep, eps=eps, vmem_limit_bytes=vmem_limit_bytes)


def _reference(x, w1, b1, w2, b2, gamma, beta, eps=1e-6,
               compute_dtype=jnp.bfloat16):
    # Pure-JAX reference mirroring the PyTorch forward (eval mode), with the
    # same bf16-operand / f32-accumulation choices as the kernel so the check
    # verifies kernel correctness rather than bf16 rounding.
    xc = x.astype(compute_dtype)
    h = jnp.einsum('bsd,fd->bsf', xc, w1.astype(compute_dtype),
                   preferred_element_type=jnp.float32) + b1
    h = jnp.maximum(h, 0.0)
    y = jnp.einsum('bsf,df->bsd', h.astype(compute_dtype),
                   w2.astype(compute_dtype),
                   preferred_element_type=jnp.float32) + b2
    z = x + y
    mean = jnp.mean(z, axis=-1, keepdims=True)
    diff = z - mean
    d = z.shape[-1]
    std = jnp.sqrt(jnp.sum(diff * diff, axis=-1, keepdims=True) / (d - 1))
    return gamma * (diff / (std + eps)) + beta


if __name__ == "__main__":
    B, S, d_model, d_ff = 2, 8, 32, 64

    key = jax.random.PRNGKey(0)
    kx, k1, kb1, k2, kb2 = jax.random.split(key, 5)

    x = jax.random.normal(kx, (B, S, d_model), dtype=jnp.float32)

    # Deterministic params (shapes match nn.Conv1d(d_model,d_ff,1) / (d_ff,d_model,1)
    # with the kernel-size-1 dim squeezed).
    w1 = jax.random.normal(k1, (d_ff, d_model), dtype=jnp.float32) * 0.1
    b1 = jax.random.normal(kb1, (d_ff,), dtype=jnp.float32) * 0.05
    w2 = jax.random.normal(k2, (d_model, d_ff), dtype=jnp.float32) * 0.1
    b2 = jax.random.normal(kb2, (d_ff,), dtype=jnp.float32)[:d_model] * 0.05
    gamma = jnp.ones((d_model,), dtype=jnp.float32)
    beta = jnp.zeros((d_model,), dtype=jnp.float32)

    out = poswise_ffn(x, w1, b1, w2, b2, gamma, beta)
    out = jax.block_until_ready(out)

    ref = _reference(x, w1, b1, w2, b2, gamma, beta)
    assert out.shape == (B, S, d_model)
    assert jnp.allclose(out, ref, atol=1e-2, rtol=1e-2), "mismatch vs reference"

    print("KERNEL_OK")
</pallas_src>

<mosaic_0001>
module attributes {stable_mosaic.version = 11 : i64} {
  func.func @_ffn_kernel(%arg0: i32, %arg1: i32, %arg2: memref<16x128xf32, #tpu.memory_space<vmem>>, %arg3: memref<1x128xf32, #tpu.memory_space<vmem>>, %arg4: memref<128x128xbf16, #tpu.memory_space<vmem>>, %arg5: memref<1x128xf32, #tpu.memory_space<vmem>>, %arg6: memref<128x128xbf16, #tpu.memory_space<vmem>>, %arg7: memref<1x128xf32, #tpu.memory_space<vmem>>, %arg8: memref<1x128xf32, #tpu.memory_space<vmem>>, %arg9: memref<1x128xf32, #tpu.memory_space<vmem>>, %arg10: memref<16x128xf32, #tpu.memory_space<vmem>>, %arg11: memref<16x128xbf16, #tpu.memory_space<vmem>>, %arg12: memref<16x128xf32, #tpu.memory_space<vmem>>) attributes {dimension_semantics = [#tpu.dimension_semantics<parallel>, #tpu.dimension_semantics<arbitrary>], iteration_bounds = array<i64: 1, 1>, scalar_prefetch = 0 : i64, scratch_operands = 2 : i64, tpu.core_type = #tpu.core_type<tc>, window_params = [{transform_indices = @transform_0, window_bounds = array<i64: 16, 128>}, {pipeline_mode = #tpu.pipeline_mode<synchronous>, transform_indices = @transform_1, window_bounds = array<i64: 1, 128>}, {transform_indices = @transform_2, window_bounds = array<i64: 128, 128>}, {transform_indices = @transform_3, window_bounds = array<i64: 1, 128>}, {transform_indices = @transform_4, window_bounds = array<i64: 128, 128>}, {pipeline_mode = #tpu.pipeline_mode<synchronous>, transform_indices = @transform_5, window_bounds = array<i64: 1, 128>}, {pipeline_mode = #tpu.pipeline_mode<synchronous>, transform_indices = @transform_6, window_bounds = array<i64: 1, 128>}, {pipeline_mode = #tpu.pipeline_mode<synchronous>, transform_indices = @transform_7, window_bounds = array<i64: 1, 128>}, {transform_indices = @transform_8, window_bounds = array<i64: 16, 128>}]} {
    %c0_i32 = arith.constant 0 : i32
    %0 = arith.cmpi eq, %arg1, %c0_i32 : i32
    %1 = arith.extui %0 : i1 to i32
    %c0_i32_0 = arith.constant 0 : i32
    %2 = arith.cmpi ne, %1, %c0_i32_0 : i32
    scf.if %2 {
      %c0_16 = arith.constant 0 : index
      %c0_17 = arith.constant 0 : index
      %20 = vector.load %arg2[%c0_16, %c0_17] : memref<16x128xf32, #tpu.memory_space<vmem>>, vector<16x128xf32>
      %21 = arith.truncf %20 : vector<16x128xf32> to vector<16x128xbf16>
      %c0_18 = arith.constant 0 : index
      %c0_19 = arith.constant 0 : index
      %22 = vector.load %arg11[%c0_18, %c0_19] : memref<16x128xbf16, #tpu.memory_space<vmem>>, vector<16x128xbf16>
      tpu.vector_store %arg11[%c0_18, %c0_19], %21 {strides = array<i32>} : memref<16x128xbf16, #tpu.memory_space<vmem>>, vector<16x128xbf16>,
      %cst_20 = arith.constant 0.000000e+00 : f32
      %23 = vector.broadcast %cst_20 : f32 to vector<16x128xf32>
      %c0_21 = arith.constant 0 : index
      %c0_22 = arith.constant 0 : index
      %24 = vector.load %arg12[%c0_21, %c0_22] : memref<16x128xf32, #tpu.memory_space<vmem>>, vector<16x128xf32>
      tpu.vector_store %arg12[%c0_21, %c0_22], %23 {strides = array<i32>} : memref<16x128xf32, #tpu.memory_space<vmem>>, vector<16x128xf32>,
    } else {
    }
    %c0 = arith.constant 0 : index
    %c0_1 = arith.constant 0 : index
    %3 = vector.load %arg11[%c0, %c0_1] : memref<16x128xbf16, #tpu.memory_space<vmem>>, vector<16x128xbf16>
    %c0_2 = arith.constant 0 : index
    %c0_3 = arith.constant 0 : index
    %4 = vector.load %arg4[%c0_2, %c0_3] : memref<128x128xbf16, #tpu.memory_space<vmem>>, vector<128x128xbf16>
    %cst = arith.constant dense<0.000000e+00> : vector<16x128xf32>
    %5 = tpu.matmul %3, %4, %cst {dimension_numbers = #tpu.dot_dimension_numbers<[1], [0], [0], [1], [0, 0, 1, 1], [], []>} : vector<16x128xbf16>, vector<128x128xbf16>, vector<16x128xf32> -> vector<16x128xf32>
    %c0_4 = arith.constant 0 : index
    %c0_5 = arith.constant 0 : index
    %6 = vector.load %arg5[%c0_4, %c0_5] : memref<1x128xf32, #tpu.memory_space<vmem>>, vector<1x128xf32>
    %7 = vector.broadcast %6 : vector<1x128xf32> to vector<16x128xf32>
    %8 = arith.addf %5, %7 : vector<16x128xf32>
    %cst_6 = arith.constant 0.000000e+00 : f32
    %9 = vector.broadcast %cst_6 : f32 to vector<16x128xf32>
    %10 = arith.maximumf %8, %9 : vector<16x128xf32>
    %c0_7 = arith.constant 0 : index
    %c0_8 = arith.constant 0 : index
    %11 = vector.load %arg12[%c0_7, %c0_8] : memref<16x128xf32, #tpu.memory_space<vmem>>, vector<16x128xf32>
    %12 = arith.truncf %10 : vector<16x128xf32> to vector<16x128xbf16>
    %c0_9 = arith.constant 0 : index
    %c0_10 = arith.constant 0 : index
    %13 = vector.load %arg6[%c0_9, %c0_10] : memref<128x128xbf16, #tpu.memory_space<vmem>>, vector<128x128xbf16>
    %cst_11 = arith.constant dense<0.000000e+00> : vector<16x128xf32>
    %14 = tpu.matmul %12, %13, %cst_11 {dimension_numbers = #tpu.dot_dimension_numbers<[1], [0], [0], [1], [0, 0, 1, 1], [], []>} : vector<16x128xbf16>, vector<128x128xbf16>, vector<16x128xf32> -> vector<16x128xf32>
    %15 = arith.addf %11, %14 : vector<16x128xf32>
    %c0_12 = arith.constant 0 : index
    %c0_13 = arith.constant 0 : index
    %16 = vector.load %arg12[%c0_12, %c0_13] : memref<16x128xf32, #tpu.memory_space<vmem>>, vector<16x128xf32>
    tpu.vector_store %arg12[%c0_12, %c0_13], %15 {strides = array<i32>} : memref<16x128xf32, #tpu.memory_space<vmem>>, vector<16x128xf32>,
    %c0_i32_14 = arith.constant 0 : i32
    %17 = arith.cmpi eq, %arg1, %c0_i32_14 : i32
    %18 = arith.extui %17 : i1 to i32
    %c0_i32_15 = arith.constant 0 : i32
    %19 = arith.cmpi ne, %18, %c0_i32_15 : i32
    scf.if %19 {
      %c0_16 = arith.constant 0 : index
      %c0_17 = arith.constant 0 : index
      %20 = vector.load %arg2[%c0_16, %c0_17] : memref<16x128xf32, #tpu.memory_space<vmem>>, vector<16x128xf32>
      %c0_18 = arith.constant 0 : index
      %c0_19 = arith.constant 0 : index
      %21 = vector.load %arg12[%c0_18, %c0_19] : memref<16x128xf32, #tpu.memory_space<vmem>>, vector<16x128xf32>
      %22 = arith.addf %20, %21 : vector<16x128xf32>
      %c0_20 = arith.constant 0 : index
      %c0_21 = arith.constant 0 : index
      %23 = vector.load %arg7[%c0_20, %c0_21] : memref<1x128xf32, #tpu.memory_space<vmem>>, vector<1x128xf32>
      %24 = vector.broadcast %23 : vector<1x128xf32> to vector<16x128xf32>
      %25 = arith.addf %22, %24 : vector<16x128xf32>
      %cst_22 = arith.constant dense<0.000000e+00> : vector<16xf32>
      %26 = vector.multi_reduction <add>, %25, %cst_22 [1] : vector<16x128xf32> to vector<16xf32>
      %27 = vector.shape_cast %26 : vector<16xf32> to vector<16x1xf32>
      %cst_23 = arith.constant 3.125000e-02 : f32
      %28 = vector.broadcast %cst_23 : f32 to vector<16x1xf32>
      %29 = arith.mulf %27, %28 : vector<16x1xf32>
      %30 = vector.broadcast %29 : vector<16x1xf32> to vector<16x128xf32>
      %31 = arith.subf %25, %30 : vector<16x128xf32>
      %c0_24 = arith.constant 0 : index
      %c0_25 = arith.constant 0 : index
      %32 = vector.load %arg3[%c0_24, %c0_25] : memref<1x128xf32, #tpu.memory_space<vmem>>, vector<1x128xf32>
      %33 = vector.broadcast %32 : vector<1x128xf32> to vector<16x128xf32>
      %34 = arith.mulf %31, %33 : vector<16x128xf32>
      %35 = arith.mulf %34, %34 : vector<16x128xf32>
      %cst_26 = arith.constant dense<0.000000e+00> : vector<16xf32>
      %36 = vector.multi_reduction <add>, %35, %cst_26 [1] : vector<16x128xf32> to vector<16xf32>
      %37 = vector.shape_cast %36 : vector<16xf32> to vector<16x1xf32>
      %cst_27 = arith.constant 0.0322580636 : f32
      %38 = vector.broadcast %cst_27 : f32 to vector<16x1xf32>
      %39 = arith.mulf %37, %38 : vector<16x1xf32>
      %40 = math.sqrt %39 : vector<16x1xf32>
      %cst_28 = arith.constant 9.99999997E-7 : f32
      %41 = vector.broadcast %cst_28 : f32 to vector<16x1xf32>
      %42 = arith.addf %40, %41 : vector<16x1xf32>
      %cst_29 = arith.constant 1.000000e+00 : f32
      %43 = vector.broadcast %cst_29 : f32 to vector<16x1xf32>
      %44 = arith.divf %43, %42 : vector<16x1xf32>
      %c0_30 = arith.constant 0 : index
      %c0_31 = arith.constant 0 : index
      %45 = vector.load %arg8[%c0_30, %c0_31] : memref<1x128xf32, #tpu.memory_space<vmem>>, vector<1x128xf32>
      %46 = vector.broadcast %44 : vector<16x1xf32> to vector<16x128xf32>
      %47 = arith.mulf %34, %46 : vector<16x128xf32>
      %48 = vector.broadcast %45 : vector<1x128xf32> to vector<16x128xf32>
      %49 = arith.mulf %48, %47 : vector<16x128xf32>
      %c0_32 = arith.constant 0 : index
      %c0_33 = arith.constant 0 : index
      %50 = vector.load %arg9[%c0_32, %c0_33] : memref<1x128xf32, #tpu.memory_space<vmem>>, vector<1x128xf32>
      %51 = vector.broadcast %50 : vector<1x128xf32> to vector<16x128xf32>
      %52 = arith.addf %49, %51 : vector<16x128xf32>
      %c0_34 = arith.constant 0 : index
      %c0_35 = arith.constant 0 : index
      %53 = vector.load %arg10[%c0_34, %c0_35] : memref<16x128xf32, #tpu.memory_space<vmem>>, vector<16x128xf32>
      tpu.vector_store %arg10[%c0_34, %c0_35], %52 {strides = array<i32>} : memref<16x128xf32, #tpu.memory_space<vmem>>, vector<16x128xf32>,
    } else {
    }
    return
  }
  func.func @transform_0(%arg0: i32, %arg1: i32) -> (i32, i32) {
    %c0_i32 = arith.constant 0 : i32
    %c0_i32_0 = arith.constant 0 : i32
    return %arg0, %c0_i32 : i32, i32
  }
  func.func @transform_1(%arg0: i32, %arg1: i32) -> (i32, i32) {
    %c0_i32 = arith.constant 0 : i32
    %c0_i32_0 = arith.constant 0 : i32
    %c0_i32_1 = arith.constant 0 : i32
    return %c0_i32, %c0_i32_0 : i32, i32
  }
  func.func @transform_2(%arg0: i32, %arg1: i32) -> (i32, i32) {
    %c0_i32 = arith.constant 0 : i32
    %c0_i32_0 = arith.constant 0 : i32
    return %c0_i32, %arg1 : i32, i32
  }
  func.func @transform_3(%arg0: i32, %arg1: i32) -> (i32, i32) {
    %c0_i32 = arith.constant 0 : i32
    %c0_i32_0 = arith.constant 0 : i32
    return %c0_i32, %arg1 : i32, i32
  }
  func.func @transform_4(%arg0: i32, %arg1: i32) -> (i32, i32) {
    %c0_i32 = arith.constant 0 : i32
    %c0_i32_0 = arith.constant 0 : i32
    return %arg1, %c0_i32 : i32, i32
  }
  func.func @transform_5(%arg0: i32, %arg1: i32) -> (i32, i32) {
    %c0_i32 = arith.constant 0 : i32
    %c0_i32_0 = arith.constant 0 : i32
    %c0_i32_1 = arith.constant 0 : i32
    return %c0_i32, %c0_i32_0 : i32, i32
  }
  func.func @transform_6(%arg0: i32, %arg1: i32) -> (i32, i32) {
    %c0_i32 = arith.constant 0 : i32
    %c0_i32_0 = arith.constant 0 : i32
    %c0_i32_1 = arith.constant 0 : i32
    return %c0_i32, %c0_i32_0 : i32, i32
  }
  func.func @transform_7(%arg0: i32, %arg1: i32) -> (i32, i32) {
    %c0_i32 = arith.constant 0 : i32
    %c0_i32_0 = arith.constant 0 : i32
    %c0_i32_1 = arith.constant 0 : i32
    return %c0_i32, %c0_i32_0 : i32, i32
  }
  func.func @transform_8(%arg0: i32, %arg1: i32) -> (i32, i32) {
    %c0_i32 = arith.constant 0 : i32
    %c0_i32_0 = arith.constant 0 : i32
    return %arg0, %c0_i32 : i32, i32
  }
}

</mosaic_0001>

<bundles_post_ra>
// kernel: tpu_custom_call.1
= control target key start
LH: loop header
LB: loop body
LE: loop exit
PB: predicated region body
PF: predicated region fallthrough
CT: control target
= control target key end

     0   :  { %13 = vsyncpa [#allocation5], 0  ;;  %s742_s0 = inlined_call_operand.hbm [shape: f32[16,128], index: 0, kind: input, shape index: {}]   ;;  %s743_s1 = inlined_call_operand.hbm [shape: f32[1,128], index: 1, kind: input, shape index: {}]   ;;  %s744_s2 = inlined_call_operand.hbm [shape: bf16[128,128], index: 2, kind: input, shape index: {}]   ;;  %s745_s3 = inlined_call_operand.vmem [shape: f32[1,128], index: 3, kind: input, shape index: {}]   ;;  %s746_s4 = inlined_call_operand.hbm [shape: bf16[128,128], index: 4, kind: input, shape index: {}]   ;;  %s747_s5 = inlined_call_operand.vmem [shape: f32[1,128], index: 5, kind: input, shape index: {}]   ;;  %s748_s6 = inlined_call_operand.vmem [shape: f32[1,128], index: 6, kind: input, shape index: {}]   ;;  %s749_s7 = inlined_call_operand.vmem [shape: f32[1,128], index: 7, kind: input, shape index: {}]   ;;  %s750_s8 = inlined_call_operand.hbm [shape: f32[16,128], index: 8, kind: output, shape index: {}]  }
   0x1   :  { %14 = vsyncpa [#allocation8], 0 }
   0x2   :  { %15 = vsyncpa [#allocation11], 0  ;;  %s35_s29 = sshll.u32 %s743_s1, 4  ;;  %s36_s29 = int_to_ptr.hbm [resolvable:$true] %s35_s29 }
   0x3   :  { %16 = vsyncpa [#allocation6], 0  ;;  %s650_s30 = smov [#allocation7]   ;;  %s21_s12 = sshll.u32 %s742_s0, 4  ;;  %s22_s12 = int_to_ptr.hbm [resolvable:$true] %s21_s12 }
   0x4   :  { %s37_s9 = sshll.u32 %s650_s30, 4  ;;  %s651_s13 = smov [#allocation4]   ;;  %s38_s9 = int_to_ptr.vmem [resolvable:$true] %s37_s9 }
   0x5   :  { %40 = dma.hbm_to_vmem [thread:$0]  %s36_s29, 16, %s38_s9, [#allocation8]  }
   0x6   :  { %s23_s14 = sshll.u32 %s651_s13, 4  ;;  %s652_s15 = smov 128   ;;  %s24_s14 = int_to_ptr.vmem [resolvable:$true] %s23_s14 }
   0x7   :  { %s653_s16 = smov 8   ;;  %s45_s18 = sshll.u32 %s744_s2, 4  ;;  %s46_s18 = int_to_ptr.hbm [resolvable:$true] %s45_s18 }
   0x8   :  { %29 = dma.hbm_to_vmem [thread:$0]  %s22_s12, 256, %s24_s14, [#allocation5], %s652_s15, %s652_s15, %s653_s16  }
   0x9   :  { %s654_s19 = smov [#allocation9]   ;;  %s60_s22 = sshll.u32 %s746_s4, 4  ;;  %s61_s22 = int_to_ptr.hbm [resolvable:$true] %s60_s22 }
   0xa   :  { %s47_s20 = sshll.u32 %s654_s19, 4  ;;  %s655_s23 = smov 64   ;;  %s48_s20 = int_to_ptr.vmem [resolvable:$true] %s47_s20 }
   0xb   :  { %s656_s24 = smov 4   ;;  %s657_s25 = smov [#allocation10]  }
   0xc   :  { %53 = dma.hbm_to_vmem [thread:$0]  %s46_s18, 1024, %s48_s20, [#allocation8], %s655_s23, %s655_s23, %s656_s24  }
   0xd   :  { %s62_s26 = sshll.u32 %s657_s25, 4  ;;  %s63_s26 = int_to_ptr.vmem [resolvable:$true] %s62_s26 }
   0xe   :  { %68 = dma.hbm_to_vmem [thread:$0]  %s61_s22, 1024, %s63_s26, [#allocation11], %s655_s23, %s655_s23, %s656_s24  }
   0xf   :  { %642 = dma.done.wait [#allocation5], 256  }
  0x10   :  { %643 = vsyncadd [#allocation5], 4294967040 }
  0x11   :  { %644 = dma.done.wait [#allocation8], 1040  }
  0x12   :  { %645 = vsyncadd [#allocation8], 4294966256 }
  0x13   :  { %646 = dma.done.wait [#allocation11], 1024  }
  0x14   :  { %647 = vsyncadd [#allocation11], 4294966272  ;;  %v486_v0 = vld [vmem:[#allocation9 + $0x38] sm:$0xff]  ;;  %v485_v1 = vld [vmem:[#allocation9 + $0x30] sm:$0xff]  ;;  %s395_s11 = sshll.u32 %s750_s8, 4  ;;  %s396_s11 = int_to_ptr.hbm [resolvable:$true] %s395_s11 }
  0x15   :  { %179 = vmatpush.bf16.msra.mxu0 %v486_v0  ;;  %v95_v2 = vld [vmem:[#allocation4] sm:$0xff]  ;;  %v96_v3 = vld [vmem:[#allocation4 + $0x8] sm:$0xff]  ;;  %v483_v9 = vld [vmem:[#allocation9 + $0x20] sm:$0xff] }
  0x16   :  { %v494_v4 = vld [vmem:[#allocation10 + $0x38] sm:$0xff]  ;;  %v498_v5 = vpack.c.bf16 %v96_v3, %v95_v2  ;;  %v493_v6 = vld [vmem:[#allocation10 + $0x30] sm:$0xff]  ;;  %v484_v7 = vld [vmem:[#allocation9 + $0x28] sm:$0xff] }
  0x17   :  { %262 = vmatpush.bf16.msra.mxu1 %v494_v4  ;;  %v492_v8 = vld [vmem:[#allocation10 + $0x28] sm:$0xff]  ;;  %v491_v10 = vld [vmem:[#allocation10 + $0x20] sm:$0xff]  ;;  %v482_v11 = vld [vmem:[#allocation9 + $0x18] sm:$0xff] }
  0x18   :  { %499 = vst [vmem:[#allocation2] sm:$0xff] %v498_v5   ;;  %v481_v12 = vld [vmem:[#allocation9 + $0x10] sm:$0xff]  ;;  %v480_v13 = vld [vmem:[#allocation9 + $0x8] sm:$0xff]  ;;  %v479_v14 = vld [vmem:[#allocation9] sm:$0xff] }
  0x19   :  { %180 = vmatpush.bf16.msra.mxu0 %v485_v1  ;;  %v490_v16 = vld [vmem:[#allocation10 + $0x18] sm:$0xff]  ;;  %v489_v17 = vld [vmem:[#allocation10 + $0x10] sm:$0xff]  ;;  %v488_v18 = vld [vmem:[#allocation10 + $0x8] sm:$0xff] }
  0x1a   :  { %v487_v19 = vld [vmem:[#allocation10] sm:$0xff]  ;;  %v511_v37 = vld [vmem:[#allocation7] ss:$0 sm:$0xff] }
  0x1b   :  { %263 = vmatpush.bf16.msra.mxu1 %v493_v6  ;;  %v509_v21 = vld [vmem:[%s745_s3] ss:$0 sm:$0xff] }
  0x1c   :  { %v510_v28 = vld [vmem:[%s747_s5] ss:$0 sm:$0xff] }
  0x1d   :  { %181 = vmatpush.bf16.msra.mxu0 %v484_v7 }
  0x1f   :  { %264 = vmatpush.bf16.msra.mxu1 %v492_v8  ;;  %v478_v15 = vld [vmem:[#allocation2] sm:$0xff] }
  0x21   :  { %182 = vmatpush.bf16.msra.mxu0 %v483_v9 }
  0x23   :  { %265 = vmatpush.bf16.msra.mxu1 %v491_v10 }
  0x25   :  { %183 = vmatpush.bf16.msra.mxu0 %v482_v11 }
  0x27   :  { %266 = vmatpush.bf16.msra.mxu1 %v490_v16 }
  0x29   :  { %184 = vmatpush.bf16.msra.mxu0 %v481_v12 }
  0x2b   :  { %267 = vmatpush.bf16.msra.mxu1 %v489_v17 }
  0x2d   :  { %185 = vmatpush.bf16.msra.mxu0 %v480_v13 }
  0x2f   :  { %268 = vmatpush.bf16.msra.mxu1 %v488_v18 }
  0x31   :  { %186 = vmatpush.bf16.msra.mxu0 %v479_v14 }
  0x33   :  { %269 = vmatpush.bf16.msra.mxu1 %v487_v19  ;;  %v512_v19 = vld [vmem:[%s748_s6] ss:$0 sm:$0xff]  ;;  %s658_s6 = smov [#allocation12]  }
  0x34   :  { %187 = vmatmul.bf16.vlgmr.msra.gmra.mxu0 %v478_v15  ;;  %s393_s9 = sshll.u32 %s658_s6, 4  ;;  %s394_s9 = int_to_ptr.vmem [resolvable:$true] %s393_s9 }
  0xb1   :  { %v188_v20 = vpop.f32.mrf.mxu0 }
  0xb2   :  { %v189_v22 = vadd.f32 %v509_v21, %v188_v20 }
  0xb4   :  { %v193_v25 = vmax.f32 %v189_v22, 0.0 }
  0xb9   :  { %v190_v23 = vpop.f32.mrf.mxu0 }
  0xba   :  { %v191_v24 = vadd.f32 %v509_v21, %v190_v23  ;;  %v513_v23 = vld [vmem:[%s749_s7] ss:$0 sm:$0xff] }
  0xbc   :  { %v194_v26 = vmax.f32 %v191_v24, 0.0 }
  0xbe   :  { %v197_v27 = vpack.c.bf16 %v194_v26, %v193_v25 }
  0xc0   :  { %270 = vmatmul.bf16.vlgmr.msra.gmra.mxu1 %v197_v27 }
 0x13d   :  { %v271_v29 = vpop.f32.mrf.mxu1 }
 0x13e   :  { %v287_v30 = vadd.f32 %v271_v29, %v95_v2 }
 0x140   :  { %v293_v31 = vadd.f32 %v510_v28, %v287_v30 }
 0x142   :  { %295 = vadd.xlane.f32.xlu0 %v293_v31 }
 0x145   :  { %v273_v32 = vpop.f32.mrf.mxu1 }
 0x146   :  { %v288_v33 = vadd.f32 %v273_v32, %v96_v3 }
 0x148   :  { %v294_v34 = vadd.f32 %v510_v28, %v288_v33 }
 0x14a   :  { %297 = vadd.xlane.f32.xlu0 %v294_v34 }
 0x1b5   :  { %v296_v35 = vpop.xlane.xlu0 %295 }
 0x1b6   :  { %v299_v36 = vmul.f32 0.03125, %v296_v35 }
 0x1b8   :  { %v301_v38 = vsub.f32 %v293_v31, %v299_v36 }
 0x1ba   :  { %v307_v39 = vmul.f32 %v511_v37, %v301_v38 }
 0x1bc   :  { %v309_v40 = vmul.f32 %v307_v39, %v307_v39 }
 0x1bd   :  { %v298_v41 = vpop.xlane.xlu0 %297 }
 0x1be   :  { %v300_v42 = vmul.f32 0.03125, %v298_v41  ;;  %311 = vadd.xlane.f32.xlu1 %v309_v40 }
 0x1c0   :  { %v302_v43 = vsub.f32 %v294_v34, %v300_v42 }
 0x1c2   :  { %v725_v44 = vmul.f32 %v511_v37, %v302_v43 }
 0x1c4   :  { %v310_v45 = vmul.f32 %v725_v44, %v725_v44 }
 0x1c6   :  { %313 = vadd.xlane.f32.xlu1 %v310_v45 }
 0x231   :  { %v312_v46 = vpop.xlane.xlu1 %311 }
 0x232   :  { %v315_v47 = vmul.f32 0.032258064, %v312_v46 }
 0x234   :  { %514 = vrsqrt.f32 %v315_v47  ;;  %vm324_vm0 = vcmp.eq.f32.partialorder %v315_v47, inf  ;;  %v327_v60 = vand.u32 2147483648, %v315_v47  ;;  %vm326_vm1 = vcmp.eq.f32.partialorder %v315_v47, 0.0 }
 0x239   :  { %v314_v48 = vpop.xlane.xlu1 %313 }
 0x23a   :  { %v515_v49 = vpop.eup %514  ;;  %v316_v50 = vmul.f32 0.032258064, %v314_v48 }
 0x23b   :  { %v318_v51 = vmul.f32 %v515_v49, %v315_v47 }
 0x23c   :  { %516 = vrsqrt.f32 %v316_v50  ;;  %vm336_vm2 = vcmp.eq.f32.partialorder %v316_v50, inf  ;;  %v339_v4 = vand.u32 2147483648, %v316_v50  ;;  %vm338_vm3 = vcmp.eq.f32.partialorder %v316_v50, 0.0 }
 0x23d   :  { %v319_v52 = vmul.f32 %v515_v49, %v318_v51 }
 0x23f   :  { %v320_v53 = vmul.f32 0.5, %v319_v52 }
 0x241   :  { %v321_v54 = vsub.f32 1.5, %v320_v53 }
 0x242   :  { %v517_v55 = vpop.eup %516 }
 0x243   :  { %v322_v56 = vmul.f32 %v515_v49, %v321_v54  ;;  %v330_v57 = vmul.f32 %v517_v55, %v316_v50 }
 0x245   :  { %v323_v58 = vmul.f32 %v322_v56, %v315_v47  ;;  %v331_v59 = vmul.f32 %v517_v55, %v330_v57 }
 0x247   :  { %v325_v61 = vsel %vm324_vm0, %v315_v47, %v323_v58  ;;  %v332_v62 = vmul.f32 0.5, %v331_v59 }
 0x248   :  { %v328_v63 = vsel %vm326_vm1, %v327_v60, %v325_v61 }
 0x249   :  { %v341_v0 = vadd.f32 1e-06, %v328_v63  ;;  %v333_v1 = vsub.f32 1.5, %v332_v62 }
 0x24b   :  { %518 = vrcp.f32 %v341_v0  ;;  %v334_v2 = vmul.f32 %v517_v55, %v333_v1  ;;  %v354_v11 = vand.u32 2147483648, %v341_v0  ;;  %v352_v13 = vand.u32 2147483647, %v341_v0 }
 0x24c   :  { %vm348_vm5 = vweird.f32 %v341_v0 }
 0x24d   :  { %v335_v3 = vmul.f32 %v334_v2, %v316_v50  ;;  %v355_v16 = vor.u32 1.1754944e-38, %v354_v11  ;;  %vm353_vm7 = vcmp.eq.f32.partialorder %v352_v13, 8.507059e+37 }
 0x24f   :  { %v337_v5 = vsel %vm336_vm2, %v316_v50, %v335_v3 }
 0x250   :  { %v340_v6 = vsel %vm338_vm3, %v339_v4, %v337_v5 }
 0x251   :  { %v519_v7 = vpop.eup %518  ;;  %v342_v8 = vadd.f32 1e-06, %v340_v6 }
 0x252   :  { %v344_v9 = vmul.f32 %v519_v7, %v341_v0  ;;  %vm349_vm4 = vweird.f32 %v519_v7 }
 0x253   :  { %520 = vrcp.f32 %v342_v8  ;;  %vm350_vm6 = vmor %vm348_vm5, %vm349_vm4  ;;  %v369_v24 = vand.u32 2147483648, %v342_v8  ;;  %v367_v26 = vand.u32 2147483647, %v342_v8  ;;  %vm363_vm9 = vweird.f32 %v342_v8 }
 0x254   :  { %v345_v10 = vsub.f32 1.0, %v344_v9 }
 0x255   :  { %v370_v30 = vor.u32 1.1754944e-38, %v369_v24  ;;  %vm368_vm11 = vcmp.eq.f32.partialorder %v367_v26, 8.507059e+37 }
 0x256   :  { %v346_v12 = vmul.f32 %v519_v7, %v345_v10 }
 0x258   :  { %v347_v14 = vadd.f32 %v519_v7, %v346_v12 }
 0x259   :  { %v521_v15 = vpop.eup %520 }
 0x25a   :  { %v351_v17 = vsel %vm350_vm6, %v519_v7, %v347_v14  ;;  %v359_v18 = vmul.f32 %v521_v15, %v342_v8  ;;  %vm364_vm8 = vweird.f32 %v521_v15 }
 0x25b   :  { %v356_v20 = vsel %vm353_vm7, %v355_v16, %v351_v17  ;;  %vm365_vm10 = vmor %vm363_vm9, %vm364_vm8 }
 0x25c   :  { %v360_v21 = vsub.f32 1.0, %v359_v18  ;;  %v374_v22 = vmul.f32 %v356_v20, %v307_v39 }
 0x25e   :  { %v361_v25 = vmul.f32 %v521_v15, %v360_v21  ;;  %v379_v27 = vmul.f32 %v512_v19, %v374_v22 }
 0x260   :  { %v362_v28 = vadd.f32 %v521_v15, %v361_v25  ;;  %v385_v29 = vadd.f32 %v513_v23, %v379_v27 }
 0x262   :  { %v366_v31 = vsel %vm365_vm10, %v521_v15, %v362_v28  ;;  %387 = vst [vmem:[#allocation12] sm:$0xff] %v385_v29 }
 0x263   :  { %v371_v32 = vsel %vm368_vm11, %v370_v30, %v366_v31 }
 0x264   :  { %v375_v33 = vmul.f32 %v371_v32, %v725_v44 }
 0x266   :  { %v380_v34 = vmul.f32 %v512_v19, %v375_v33 }
 0x268   :  { %v386_v35 = vadd.f32 %v513_v23, %v380_v34 }
 0x26a   :  { %388 = vst [vmem:[#allocation12 + $0x8] sm:$0xff] %v386_v35 }
 0x26b   :  { %401 = dma.vmem_to_hbm [thread:$0]  %s394_s9, 256, %s396_s11, [#allocation6], %s652_s15, %s652_s15, %s653_s16  }
 0x26c   :  { %648 = dma.done.wait [#allocation6], 256  }
 0x26d   :  { %649 = vsyncadd [#allocation6], 4294967040 }
 0x26e   :  { %406 = vsyncpa [#allocation5], 1 }
 0x26f   :  { %407 = vsyncpa [#allocation8], 1 }
 0x270   :  { %408 = vsyncpa [#allocation11], 1 }
 0x271   :  { %409 = vsyncpa [#allocation6], 1 }

</bundles_post_ra>
